<compile_context>
chip_gen: v6e
topology: v6e:2x2x1
jax: 0.10.0
libtpu: 0.0.40
codegen_flags: <defaults>
</compile_context>

<pallas_src>
import jax
import jax.numpy as jnp
from jax.experimental import pallas as pl
from jax.experimental.pallas import tpu as pltpu  # noqa: F401  (kept for TPU backend import)


def _bmm_kernel(lhs_ref, rhs_ref, out_ref):
    # lhs_ref: (B, M, K) = (20, 6, 7) in VMEM (whole array, single invocation)
    # rhs_ref: (B, K, N) = (20, 7, 6) in VMEM
    # out_ref: (B, M, N) = (20, 6, 6)
    a = lhs_ref[...]
    b = rhs_ref[...]
    out_ref[...] = jnp.einsum(
        "bmk,bkn->bmn", a, b, preferred_element_type=jnp.float32
    ).astype(out_ref.dtype)


def matmul4d_static(lhs, rhs):
    """Pallas implementation of torch.matmul for static 4-D batched matmul.

    lhs: (B0, B1, M, K) f32   e.g. (4, 5, 6, 7)
    rhs: (B0, B1, K, N) f32   e.g. (4, 5, 7, 6)
    returns: (B0, B1, M, N) f32
    """
    B0, B1, M, K = lhs.shape
    rb0, rb1, rk, N = rhs.shape
    assert (B0, B1) == (rb0, rb1) and K == rk, (lhs.shape, rhs.shape)

    B = B0 * B1
    lhs_f = lhs.reshape(B, M, K)
    rhs_f = rhs.reshape(B, K, N)

    # No grid, no BlockSpecs: single invocation, whole arrays resident in VMEM.
    # (Everything here is ~10 KB total, far below VMEM limits on v5e/v6e/v7x.)
    out_f = pl.pallas_call(
        _bmm_kernel,
        out_shape=jax.ShapeDtypeStruct((B, M, N), jnp.float32),
    )(lhs_f, rhs_f)

    return out_f.reshape(B0, B1, M, N)


if __name__ == "__main__":
    key = jax.random.PRNGKey(0)
    k1, k2 = jax.random.split(key)
    lhs = jax.random.normal(k1, (4, 5, 6, 7), dtype=jnp.float32)
    rhs = jax.random.normal(k2, (4, 5, 7, 6), dtype=jnp.float32)

    out = matmul4d_static(lhs, rhs)
    out = jax.block_until_ready(out)

    # Reference: plain JAX batched matmul (same semantics as torch.matmul here).
    ref = jnp.matmul(lhs, rhs)
    assert out.shape == (4, 5, 6, 6), out.shape
    assert jnp.allclose(out, ref, atol=1e-5, rtol=1e-5), "mismatch vs reference"

    print("KERNEL_OK")
</pallas_src>

<mosaic_0001>
module attributes {stable_mosaic.version = 11 : i64} {
  func.func @_bmm_kernel(%arg0: memref<20x6x7xf32, #tpu.memory_space<vmem>>, %arg1: memref<20x7x6xf32, #tpu.memory_space<vmem>>, %arg2: memref<20x6x6xf32, #tpu.memory_space<vmem>>) attributes {dimension_semantics = [], scalar_prefetch = 0 : i64, scratch_operands = 0 : i64, tpu.core_type = #tpu.core_type<tc>} {
    %c0 = arith.constant 0 : index
    %c0_0 = arith.constant 0 : index
    %c0_1 = arith.constant 0 : index
    %0 = vector.load %arg0[%c0, %c0_0, %c0_1] : memref<20x6x7xf32, #tpu.memory_space<vmem>>, vector<20x6x7xf32>
    %c0_2 = arith.constant 0 : index
    %c0_3 = arith.constant 0 : index
    %c0_4 = arith.constant 0 : index
    %1 = vector.load %arg1[%c0_2, %c0_3, %c0_4] : memref<20x7x6xf32, #tpu.memory_space<vmem>>, vector<20x7x6xf32>
    "tpu.trace_start"() <{level = 10 : i32, message = "bmk,bkn->bmn"}> : () -> ()
    %cst = arith.constant dense<0.000000e+00> : vector<20x6x6xf32>
    %2 = tpu.matmul %0, %1, %cst {dimension_numbers = #tpu.dot_dimension_numbers<[2], [1], [1], [2], [0, 0, 0, 1, 1, 2], [0], [0]>} : vector<20x6x7xf32>, vector<20x7x6xf32>, vector<20x6x6xf32> -> vector<20x6x6xf32>
    "tpu.trace_stop"() : () -> ()
    %c0_5 = arith.constant 0 : index
    %c0_6 = arith.constant 0 : index
    %c0_7 = arith.constant 0 : index
    %3 = vector.load %arg2[%c0_5, %c0_6, %c0_7] : memref<20x6x6xf32, #tpu.memory_space<vmem>>, vector<20x6x6xf32>
    tpu.vector_store %arg2[%c0_5, %c0_6, %c0_7], %2 {strides = array<i32>} : memref<20x6x6xf32, #tpu.memory_space<vmem>>, vector<20x6x6xf32>,
    return
  }
}

</mosaic_0001>

<bundles_post_ra>
// kernel: tpu_custom_call.1
= control target key start
LH: loop header
LB: loop body
LE: loop exit
PB: predicated region body
PF: predicated region fallthrough
CT: control target
= control target key end

     0   :  { %vm55_vm0 = vcmask 1046528   ;;  %vm51_vm1 = vcmask 56320   ;;  %v1780_v0 = vmov 0.0   ;;  %vm1781_vm2 = vmmov 0   ;;  %s2097_s1 = inlined_call_operand.vmem [shape: f32[20,7,6], index: 1, kind: input, shape index: {}]   ;;  %s2098_s0 = inlined_call_operand.vmem [shape: f32[20,6,7], index: 0, kind: input, shape index: {}]   ;;  %s2099_s2 = inlined_call_operand.vmem [shape: f32[20,6,6], index: 2, kind: output, shape index: {}]  }
   0x1   :  { %1678 = vmatprep.subr.mxu0 %v1780_v0  ;;  %1683 = vmatprep.subr.mxu1 %v1780_v0  ;;  %v31_v1 = vld [vmem:[%s2097_s1] sm:$0x7f]  ;;  %v32_v2 = vld [vmem:[%s2097_s1 + $0x8] sm:$0x7f]  ;;  %v33_v5 = vld [vmem:[%s2097_s1 + $0x10] sm:$0x7f] }
   0x2   :  { %v11_v3 = vld [vmem:[%s2098_s0] sm:$0x3f]  ;;  %1679 = vmatpush3.msk.msra.mxu0 %vm55_vm0, %v31_v1  ;;  %1680 = vmatprep.mubr.msk.f32.mxu0 %vm1781_vm2, %v1780_v0  ;;  %v12_v4 = vld [vmem:[%s2098_s0 + $0x8] sm:$0x3f]  ;;  %v34_v6 = vld [vmem:[%s2097_s1 + $0x18] sm:$0x7f] }
   0x3   :  { %1684 = vmatpush3.msk.msra.mxu1 %vm55_vm0, %v32_v2  ;;  %1685 = vmatprep.mubr.msk.f32.mxu1 %vm1781_vm2, %v1780_v0  ;;  %v13_v7 = vld [vmem:[%s2098_s0 + $0x10] sm:$0x3f]  ;;  %v14_v8 = vld [vmem:[%s2098_s0 + $0x18] sm:$0x3f]  ;;  %v35_v9 = vld [vmem:[%s2097_s1 + $0x20] sm:$0x7f] }
   0x4   :  { %1681 = vmatmul.mubr.msk.f32.vlgmr.msra.gmra.mxu0 %vm51_vm1, %v11_v3  ;;  %1686 = vmatmul.mubr.msk.f32.vlgmr.msra.gmra.mxu1 %vm51_vm1, %v12_v4  ;;  %v36_v10 = vld [vmem:[%s2097_s1 + $0x28] sm:$0x7f]  ;;  %v15_v11 = vld [vmem:[%s2098_s0 + $0x20] sm:$0x3f]  ;;  %v37_v13 = vld [vmem:[%s2097_s1 + $0x30] sm:$0x7f] }
   0x5   :  { %1688 = vmatprep.subr.mxu0 %v1780_v0  ;;  %1693 = vmatprep.subr.mxu1 %v1780_v0  ;;  %v16_v12 = vld [vmem:[%s2098_s0 + $0x28] sm:$0x3f]  ;;  %v38_v14 = vld [vmem:[%s2097_s1 + $0x38] sm:$0x7f]  ;;  %v17_v15 = vld [vmem:[%s2098_s0 + $0x30] sm:$0x3f] }
   0x6   :  { %1689 = vmatpush3.msk.msra.mxu0 %vm55_vm0, %v33_v5  ;;  %1694 = vmatpush3.msk.msra.mxu1 %vm55_vm0, %v34_v6  ;;  %v18_v16 = vld [vmem:[%s2098_s0 + $0x38] sm:$0x3f]  ;;  %v39_v17 = vld [vmem:[%s2097_s1 + $0x40] sm:$0x7f]  ;;  %v40_v18 = vld [vmem:[%s2097_s1 + $0x48] sm:$0x7f] }
   0x7   :  { %1690 = vmatprep.mubr.msk.f32.mxu0 %vm1781_vm2, %v1780_v0  ;;  %1695 = vmatprep.mubr.msk.f32.mxu1 %vm1781_vm2, %v1780_v0  ;;  %v19_v19 = vld [vmem:[%s2098_s0 + $0x40] sm:$0x3f]  ;;  %v20_v20 = vld [vmem:[%s2098_s0 + $0x48] sm:$0x3f]  ;;  %v41_v21 = vld [vmem:[%s2097_s1 + $0x50] sm:$0x7f] }
   0x8   :  { %1691 = vmatmul.mubr.msk.f32.vlgmr.msra.gmra.mxu0 %vm51_vm1, %v13_v7  ;;  %1696 = vmatmul.mubr.msk.f32.vlgmr.msra.gmra.mxu1 %vm51_vm1, %v14_v8  ;;  %v42_v22 = vld [vmem:[%s2097_s1 + $0x58] sm:$0x7f]  ;;  %v21_v23 = vld [vmem:[%s2098_s0 + $0x50] sm:$0x3f]  ;;  %v43_v25 = vld [vmem:[%s2097_s1 + $0x60] sm:$0x7f] }
   0x9   :  { %1698 = vmatprep.subr.mxu0 %v1780_v0  ;;  %1703 = vmatprep.subr.mxu1 %v1780_v0  ;;  %v22_v24 = vld [vmem:[%s2098_s0 + $0x58] sm:$0x3f]  ;;  %v44_v26 = vld [vmem:[%s2097_s1 + $0x68] sm:$0x7f]  ;;  %v23_v27 = vld [vmem:[%s2098_s0 + $0x60] sm:$0x3f] }
   0xa   :  { %1699 = vmatpush3.msk.msra.mxu0 %vm55_vm0, %v35_v9  ;;  %1704 = vmatpush3.msk.msra.mxu1 %vm55_vm0, %v36_v10  ;;  %v24_v28 = vld [vmem:[%s2098_s0 + $0x68] sm:$0x3f]  ;;  %v45_v29 = vld [vmem:[%s2097_s1 + $0x70] sm:$0x7f]  ;;  %v46_v30 = vld [vmem:[%s2097_s1 + $0x78] sm:$0x7f] }
   0xb   :  { %1700 = vmatprep.mubr.msk.f32.mxu0 %vm1781_vm2, %v1780_v0  ;;  %1705 = vmatprep.mubr.msk.f32.mxu1 %vm1781_vm2, %v1780_v0  ;;  %v25_v31 = vld [vmem:[%s2098_s0 + $0x70] sm:$0x3f]  ;;  %v26_v32 = vld [vmem:[%s2098_s0 + $0x78] sm:$0x3f]  ;;  %v47_v33 = vld [vmem:[%s2097_s1 + $0x80] sm:$0x7f] }
   0xc   :  { %1701 = vmatmul.mubr.msk.f32.vlgmr.msra.gmra.mxu0 %vm51_vm1, %v15_v11  ;;  %1706 = vmatmul.mubr.msk.f32.vlgmr.msra.gmra.mxu1 %vm51_vm1, %v16_v12  ;;  %v48_v34 = vld [vmem:[%s2097_s1 + $0x88] sm:$0x7f]  ;;  %v27_v35 = vld [vmem:[%s2098_s0 + $0x80] sm:$0x3f]  ;;  %v49_v37 = vld [vmem:[%s2097_s1 + $0x90] sm:$0x7f] }
   0xd   :  { %1708 = vmatprep.subr.mxu0 %v1780_v0  ;;  %1713 = vmatprep.subr.mxu1 %v1780_v0  ;;  %v28_v36 = vld [vmem:[%s2098_s0 + $0x88] sm:$0x3f]  ;;  %v50_v38 = vld [vmem:[%s2097_s1 + $0x98] sm:$0x7f]  ;;  %v29_v39 = vld [vmem:[%s2098_s0 + $0x90] sm:$0x3f] }
   0xe   :  { %1709 = vmatpush3.msk.msra.mxu0 %vm55_vm0, %v37_v13  ;;  %1714 = vmatpush3.msk.msra.mxu1 %vm55_vm0, %v38_v14  ;;  %v30_v40 = vld [vmem:[%s2098_s0 + $0x98] sm:$0x3f]  ;;  %vm1573_vm3 = vcmask 46080  }
   0xf   :  { %1710 = vmatprep.mubr.msk.f32.mxu0 %vm1781_vm2, %v1780_v0  ;;  %1715 = vmatprep.mubr.msk.f32.mxu1 %vm1781_vm2, %v1780_v0 }
  0x10   :  { %1711 = vmatmul.mubr.msk.f32.vlgmr.msra.gmra.mxu0 %vm51_vm1, %v17_v15  ;;  %1716 = vmatmul.mubr.msk.f32.vlgmr.msra.gmra.mxu1 %vm51_vm1, %v18_v16 }
  0x11   :  { %1718 = vmatprep.subr.mxu0 %v1780_v0  ;;  %1723 = vmatprep.subr.mxu1 %v1780_v0 }
  0x12   :  { %1719 = vmatpush3.msk.msra.mxu0 %vm55_vm0, %v39_v17  ;;  %1724 = vmatpush3.msk.msra.mxu1 %vm55_vm0, %v40_v18 }
  0x13   :  { %1720 = vmatprep.mubr.msk.f32.mxu0 %vm1781_vm2, %v1780_v0  ;;  %1725 = vmatprep.mubr.msk.f32.mxu1 %vm1781_vm2, %v1780_v0 }
  0x14   :  { %1721 = vmatmul.mubr.msk.f32.vlgmr.msra.gmra.mxu0 %vm51_vm1, %v19_v19  ;;  %1726 = vmatmul.mubr.msk.f32.vlgmr.msra.gmra.mxu1 %vm51_vm1, %v20_v20 }
  0x15   :  { %1728 = vmatprep.subr.mxu0 %v1780_v0  ;;  %1733 = vmatprep.subr.mxu1 %v1780_v0 }
  0x16   :  { %1729 = vmatpush3.msk.msra.mxu0 %vm55_vm0, %v41_v21  ;;  %1734 = vmatpush3.msk.msra.mxu1 %vm55_vm0, %v42_v22 }
  0x17   :  { %1730 = vmatprep.mubr.msk.f32.mxu0 %vm1781_vm2, %v1780_v0  ;;  %1735 = vmatprep.mubr.msk.f32.mxu1 %vm1781_vm2, %v1780_v0 }
  0x18   :  { %1731 = vmatmul.mubr.msk.f32.vlgmr.msra.gmra.mxu0 %vm51_vm1, %v21_v23  ;;  %1736 = vmatmul.mubr.msk.f32.vlgmr.msra.gmra.mxu1 %vm51_vm1, %v22_v24 }
  0x19   :  { %1738 = vmatprep.subr.mxu0 %v1780_v0  ;;  %1743 = vmatprep.subr.mxu1 %v1780_v0 }
  0x1a   :  { %1739 = vmatpush3.msk.msra.mxu0 %vm55_vm0, %v43_v25  ;;  %1744 = vmatpush3.msk.msra.mxu1 %vm55_vm0, %v44_v26 }
  0x1b   :  { %1740 = vmatprep.mubr.msk.f32.mxu0 %vm1781_vm2, %v1780_v0  ;;  %1745 = vmatprep.mubr.msk.f32.mxu1 %vm1781_vm2, %v1780_v0 }
  0x1c   :  { %1741 = vmatmul.mubr.msk.f32.vlgmr.msra.gmra.mxu0 %vm51_vm1, %v23_v27  ;;  %1746 = vmatmul.mubr.msk.f32.vlgmr.msra.gmra.mxu1 %vm51_vm1, %v24_v28 }
  0x1d   :  { %1748 = vmatprep.subr.mxu0 %v1780_v0  ;;  %1753 = vmatprep.subr.mxu1 %v1780_v0 }
  0x1e   :  { %1749 = vmatpush3.msk.msra.mxu0 %vm55_vm0, %v45_v29  ;;  %1754 = vmatpush3.msk.msra.mxu1 %vm55_vm0, %v46_v30 }
  0x1f   :  { %1750 = vmatprep.mubr.msk.f32.mxu0 %vm1781_vm2, %v1780_v0  ;;  %1755 = vmatprep.mubr.msk.f32.mxu1 %vm1781_vm2, %v1780_v0 }
  0x20   :  { %1751 = vmatmul.mubr.msk.f32.vlgmr.msra.gmra.mxu0 %vm51_vm1, %v25_v31  ;;  %1756 = vmatmul.mubr.msk.f32.vlgmr.msra.gmra.mxu1 %vm51_vm1, %v26_v32 }
  0x21   :  { %1758 = vmatprep.subr.mxu0 %v1780_v0  ;;  %1763 = vmatprep.subr.mxu1 %v1780_v0 }
  0x22   :  { %1759 = vmatpush3.msk.msra.mxu0 %vm55_vm0, %v47_v33  ;;  %1764 = vmatpush3.msk.msra.mxu1 %vm55_vm0, %v48_v34 }
  0x23   :  { %1760 = vmatprep.mubr.msk.f32.mxu0 %vm1781_vm2, %v1780_v0  ;;  %1765 = vmatprep.mubr.msk.f32.mxu1 %vm1781_vm2, %v1780_v0 }
  0x24   :  { %1761 = vmatmul.mubr.msk.f32.vlgmr.msra.gmra.mxu0 %vm51_vm1, %v27_v35  ;;  %1766 = vmatmul.mubr.msk.f32.vlgmr.msra.gmra.mxu1 %vm51_vm1, %v28_v36 }
  0x25   :  { %1768 = vmatprep.subr.mxu0 %v1780_v0  ;;  %1773 = vmatprep.subr.mxu1 %v1780_v0 }
  0x26   :  { %1769 = vmatpush3.msk.msra.mxu0 %vm55_vm0, %v49_v37  ;;  %1774 = vmatpush3.msk.msra.mxu1 %vm55_vm0, %v50_v38 }
  0x27   :  { %1770 = vmatprep.mubr.msk.f32.mxu0 %vm1781_vm2, %v1780_v0  ;;  %1775 = vmatprep.mubr.msk.f32.mxu1 %vm1781_vm2, %v1780_v0 }
  0x28   :  { %1771 = vmatmul.mubr.msk.f32.vlgmr.msra.gmra.mxu0 %vm51_vm1, %v29_v39  ;;  %1776 = vmatmul.mubr.msk.f32.vlgmr.msra.gmra.mxu1 %vm51_vm1, %v30_v40 }
  0xc4   :  { %v125_v41 = vpop.f32.mrf.mxu0  ;;  %v201_v42 = vpop.f32.mrf.mxu1 }
  0xc5   :  { %1574 = vst.msk [vmem:[%s2099_s2] sm:$0x3f] %vm1573_vm3, %v125_v41  ;;  %1575 = vst.msk [vmem:[%s2099_s2 + $0x8] sm:$0x3f] %vm1573_vm3, %v201_v42 }
  0xc6   :  { %v1682_v43 = vpop.f32.mrf.mxu0  ;;  %v1687_v44 = vpop.f32.mrf.mxu1 }
  0xc8   :  { %v277_v45 = vpop.f32.mrf.mxu0  ;;  %v353_v46 = vpop.f32.mrf.mxu1 }
  0xc9   :  { %1576 = vst.msk [vmem:[%s2099_s2 + $0x10] sm:$0x3f] %vm1573_vm3, %v277_v45  ;;  %1577 = vst.msk [vmem:[%s2099_s2 + $0x18] sm:$0x3f] %vm1573_vm3, %v353_v46 }
  0xca   :  { %v1692_v47 = vpop.f32.mrf.mxu0  ;;  %v1697_v48 = vpop.f32.mrf.mxu1 }
  0xcc   :  { %v429_v49 = vpop.f32.mrf.mxu0  ;;  %v505_v50 = vpop.f32.mrf.mxu1 }
  0xcd   :  { %1578 = vst.msk [vmem:[%s2099_s2 + $0x20] sm:$0x3f] %vm1573_vm3, %v429_v49  ;;  %1579 = vst.msk [vmem:[%s2099_s2 + $0x28] sm:$0x3f] %vm1573_vm3, %v505_v50 }
  0xce   :  { %v1702_v51 = vpop.f32.mrf.mxu0  ;;  %v1707_v52 = vpop.f32.mrf.mxu1 }
  0xd0   :  { %v581_v53 = vpop.f32.mrf.mxu0  ;;  %v657_v54 = vpop.f32.mrf.mxu1 }
  0xd1   :  { %1580 = vst.msk [vmem:[%s2099_s2 + $0x30] sm:$0x3f] %vm1573_vm3, %v581_v53  ;;  %1581 = vst.msk [vmem:[%s2099_s2 + $0x38] sm:$0x3f] %vm1573_vm3, %v657_v54 }
  0xd2   :  { %v1712_v55 = vpop.f32.mrf.mxu0  ;;  %v1717_v56 = vpop.f32.mrf.mxu1 }
  0xd4   :  { %v733_v57 = vpop.f32.mrf.mxu0  ;;  %v809_v58 = vpop.f32.mrf.mxu1 }
  0xd5   :  { %1582 = vst.msk [vmem:[%s2099_s2 + $0x40] sm:$0x3f] %vm1573_vm3, %v733_v57  ;;  %1583 = vst.msk [vmem:[%s2099_s2 + $0x48] sm:$0x3f] %vm1573_vm3, %v809_v58 }
  0xd6   :  { %v1722_v59 = vpop.f32.mrf.mxu0  ;;  %v1727_v60 = vpop.f32.mrf.mxu1 }
  0xd8   :  { %v885_v61 = vpop.f32.mrf.mxu0  ;;  %v961_v62 = vpop.f32.mrf.mxu1 }
  0xd9   :  { %1584 = vst.msk [vmem:[%s2099_s2 + $0x50] sm:$0x3f] %vm1573_vm3, %v885_v61  ;;  %1585 = vst.msk [vmem:[%s2099_s2 + $0x58] sm:$0x3f] %vm1573_vm3, %v961_v62 }
  0xda   :  { %v1732_v63 = vpop.f32.mrf.mxu0  ;;  %v1737_v0 = vpop.f32.mrf.mxu1 }
  0xdc   :  { %v1037_v1 = vpop.f32.mrf.mxu0  ;;  %v1113_v2 = vpop.f32.mrf.mxu1 }
  0xdd   :  { %1586 = vst.msk [vmem:[%s2099_s2 + $0x60] sm:$0x3f] %vm1573_vm3, %v1037_v1  ;;  %1587 = vst.msk [vmem:[%s2099_s2 + $0x68] sm:$0x3f] %vm1573_vm3, %v1113_v2 }
  0xde   :  { %v1742_v3 = vpop.f32.mrf.mxu0  ;;  %v1747_v4 = vpop.f32.mrf.mxu1 }
  0xe0   :  { %v1189_v5 = vpop.f32.mrf.mxu0  ;;  %v1265_v6 = vpop.f32.mrf.mxu1 }
  0xe1   :  { %1588 = vst.msk [vmem:[%s2099_s2 + $0x70] sm:$0x3f] %vm1573_vm3, %v1189_v5  ;;  %1589 = vst.msk [vmem:[%s2099_s2 + $0x78] sm:$0x3f] %vm1573_vm3, %v1265_v6 }
  0xe2   :  { %v1752_v7 = vpop.f32.mrf.mxu0  ;;  %v1757_v8 = vpop.f32.mrf.mxu1 }
  0xe4   :  { %v1341_v9 = vpop.f32.mrf.mxu0  ;;  %v1417_v10 = vpop.f32.mrf.mxu1 }
  0xe5   :  { %1590 = vst.msk [vmem:[%s2099_s2 + $0x80] sm:$0x3f] %vm1573_vm3, %v1341_v9  ;;  %1591 = vst.msk [vmem:[%s2099_s2 + $0x88] sm:$0x3f] %vm1573_vm3, %v1417_v10 }
  0xe6   :  { %v1762_v11 = vpop.f32.mrf.mxu0  ;;  %v1767_v12 = vpop.f32.mrf.mxu1 }
  0xe8   :  { %v1493_v13 = vpop.f32.mrf.mxu0  ;;  %v1569_v14 = vpop.f32.mrf.mxu1 }
  0xe9   :  { %1592 = vst.msk [vmem:[%s2099_s2 + $0x90] sm:$0x3f] %vm1573_vm3, %v1493_v13  ;;  %1593 = vst.msk [vmem:[%s2099_s2 + $0x98] sm:$0x3f] %vm1573_vm3, %v1569_v14 }
  0xea   :  { %v1772_v15 = vpop.f32.mrf.mxu0  ;;  %v1777_v16 = vpop.f32.mrf.mxu1 }

</bundles_post_ra>
